<compile_context>
chip_gen: v7x
topology: tpu7x:2x2x1
jax: 0.10.0
libtpu: 0.0.40
codegen_flags: <defaults>
</compile_context>

<pallas_src>
import math

import jax
import jax.numpy as jnp
import numpy as np
from jax import lax
from jax.experimental import pallas as pl
from jax.experimental.pallas import tpu as pltpu


def hybrid_rr_kernel(x1_ref, x2_ref, x3_ref,
                     wg_f_ref, waux_f_ref, b1_f_ref,
                     w2_ref, b2_ref, w3_ref, b3_ref,
                     out_ref, fc2_out_ref):
    f32 = jnp.float32
    bf16 = jnp.bfloat16
    tb = x1_ref.shape[0]

    # --- fc1 (layer1_glove / Embedding / layer1_bit folded in) -------------
    # Main glove path: (TB,50)bf16 @ (50,512)bf16 -> f32 accumulation.
    h = jnp.dot(x1_ref[...].astype(bf16), wg_f_ref[...],
                preferred_element_type=f32)                          # (TB,512)

    # Embedding + bit paths on the MXU: tiny (TB,4) LHS = [one_hot(x2,3)|x3]
    # against the fused (4,512) weight.  Only a few 4-lane VPU ops remain.
    idx = x2_ref[...]                                                # (TB,1) i32
    col = lax.broadcasted_iota(jnp.int32, (tb, 4), 1)                # (TB,4)
    onehot = (col == idx).astype(bf16)                               # (TB,4)
    aux = jnp.where(col == 3, x3_ref[...].astype(bf16), onehot)      # (TB,4)
    h = h + jnp.dot(aux, waux_f_ref[...], preferred_element_type=f32)

    # Fused fc1 bias kept as a separate f32 add (precision), then ReLU.
    h = jnp.maximum(h + b1_f_ref[...], 0.0)
    # dropout(p=0.5): identity in eval mode.

    # --- fc2 ----------------------------------------------------------------
    fc2 = jnp.dot(h.astype(bf16), w2_ref[...],
                  preferred_element_type=f32) + b2_ref[...]
    fc2 = jnp.maximum(fc2, 0.0)                                      # (TB,256) f32
    # dropout(p=0.5): identity in eval mode.
    # fc2 dominates the HBM writeback -> emit in bf16 (values are already
    # bf16-matmul limited).
    fc2_out_ref[...] = fc2.astype(fc2_out_ref.dtype)

    # --- fc3 (N=1) as VPU multiply + XLU lane reduce (MXU-hostile shape) ----
    out_ref[...] = (jnp.sum(fc2 * w3_ref[...], axis=-1, keepdims=True)
                    + b3_ref[...])


def fuse_params(p):
    """One-time wrapper-side fusion of everything before the first ReLU."""
    f32, bf16 = jnp.float32, jnp.bfloat16
    w1g = p["w1"][0:5, :]      # glove rows of fc1
    w1r = p["w1"][5:13, :]     # embedding rows of fc1
    w1b = p["w1"][13:14, :]    # bit rows of fc1
    wg_f = (p["wg"] @ w1g).astype(bf16)                              # (50,512)
    # Rows 0..2: Embedding(3,8) folded through fc1; row 3: layer1_bit weight.
    waux_f = jnp.concatenate([p["emb"] @ w1r, p["wb"] @ w1b],
                             axis=0).astype(bf16)                    # (4,512)
    b1_f = (p["bg"] @ w1g + p["bb"] @ w1b + p["b1"]).astype(f32)     # (1,512)
    return dict(wg_f=wg_f, waux_f=waux_f, b1_f=b1_f,
                w2=p["w2"].astype(bf16), b2=p["b2"].astype(f32),
                w3=p["w3"].reshape(1, 256).astype(f32),
                b3=p["b3"].astype(f32))


def _round_up(x, m):
    return ((x + m - 1) // m) * m


def hybrid_rr_forward(x1, x2, x3, fp):
    """HybridRR forward (eval mode). Returns (out[f32], fc2[bf16])."""
    B = x1.shape[0]
    # Batch tile: single full-array block for small batches; otherwise up to
    # 2048 rows/block with >= 2 grid steps so a v7x megacore can split the
    # "parallel" grid axis across both TensorCores.  ~12 MiB VMEM at TB=2048.
    if B <= 256:
        TB = B
    else:
        TB = min(2048, _round_up((B + 1) // 2, 8))
    grid = (pl.cdiv(B, TB),)

    x2_2d = x2.reshape(B, 1).astype(jnp.int32)

    batch_spec = lambda c: pl.BlockSpec((TB, c), lambda i: (i, 0))
    # Weights: same block index every grid step -> stay resident in VMEM.
    w_spec = lambda shape: pl.BlockSpec(shape, lambda i: (0, 0))

    # No wrapper-side padding: Pallas masks the ragged final block; tail rows
    # see unspecified input values but are row-independent and never written.
    out, fc2 = pl.pallas_call(
        hybrid_rr_kernel,
        out_shape=(jax.ShapeDtypeStruct((B, 1), jnp.float32),
                   jax.ShapeDtypeStruct((B, 256), jnp.bfloat16)),
        grid=grid,
        in_specs=[batch_spec(50), batch_spec(1), batch_spec(1),
                  w_spec((50, 512)), w_spec((4, 512)), w_spec((1, 512)),
                  w_spec((512, 256)), w_spec((1, 256)),
                  w_spec((1, 256)), w_spec((1, 1))],
        out_specs=(batch_spec(1), batch_spec(256)),
        compiler_params=pltpu.CompilerParams(
            dimension_semantics=("parallel",)),
    )(x1, x2_2d, x3,
      fp["wg_f"], fp["waux_f"], fp["b1_f"],
      fp["w2"], fp["b2"], fp["w3"], fp["b3"])
    return out, fc2


def init_params(key):
    """Deterministic init mirroring the PyTorch default initializers."""
    def linear(key, fan_in, fan_out):
        kw, kb = jax.random.split(key)
        bound = 1.0 / math.sqrt(fan_in)
        w = jax.random.uniform(kw, (fan_in, fan_out), jnp.float32, -bound, bound)
        b = jax.random.uniform(kb, (1, fan_out), jnp.float32, -bound, bound)
        return w, b

    keys = jax.random.split(key, 6)
    wg, bg = linear(keys[0], 50, 5)                                  # layer1_glove
    emb = jax.random.normal(keys[1], (3, 8), jnp.float32)            # layer1_res
    wb, bb = linear(keys[2], 1, 1)                                   # layer1_bit
    w1, b1 = linear(keys[3], 14, 512)                                # fc1
    w2, b2 = linear(keys[4], 512, 256)                               # fc2
    w3, b3 = linear(keys[5], 256, 1)                                 # fc3
    return dict(wg=wg, bg=bg, emb=emb, wb=wb, bb=bb,
                w1=w1, b1=b1, w2=w2, b2=b2, w3=w3, b3=b3)


def reference_forward(x1, x2, x3, p):
    glove = x1 @ p["wg"] + p["bg"]
    x_res = p["emb"][x2]
    bit = x3 @ p["wb"] + p["bb"]
    h = jnp.concatenate([glove, x_res, bit], axis=1)
    h = jax.nn.relu(h @ p["w1"] + p["b1"])
    fc2 = jax.nn.relu(h @ p["w2"] + p["b2"])
    out = fc2 @ p["w3"] + p["b3"]
    return out, fc2


if __name__ == "__main__":
    key = jax.random.PRNGKey(0)
    kp, k1, k2, k3 = jax.random.split(key, 4)

    params = init_params(kp)
    fused = fuse_params(params)   # one-time, outside the per-call path

    B = 8
    x1 = jax.random.normal(k1, (B, 50), jnp.float32)
    x2 = jax.random.randint(k2, (B,), 0, 3, jnp.int32)
    x3 = jax.random.normal(k3, (B, 1), jnp.float32)

    fwd = jax.jit(hybrid_rr_forward)
    out, fc2 = fwd(x1, x2, x3, fused)
    out = jax.block_until_ready(out)
    fc2 = jax.block_until_ready(fc2)

    ref_out, ref_fc2 = reference_forward(x1, x2, x3, params)
    # bf16 matmul operands / bf16 fc2 storage (f32 accumulation) -> loosened tol.
    np.testing.assert_allclose(np.asarray(out), np.asarray(ref_out),
                               rtol=5e-2, atol=5e-2)
    np.testing.assert_allclose(np.asarray(fc2.astype(jnp.float32)),
                               np.asarray(ref_fc2), rtol=5e-2, atol=5e-2)

    print("KERNEL_OK")
</pallas_src>

<mosaic_0001>
module attributes {stable_mosaic.version = 11 : i64} {
  func.func @hybrid_rr_kernel(%arg0: i32, %arg1: memref<8x50xf32, #tpu.memory_space<vmem>>, %arg2: memref<8x1xi32, #tpu.memory_space<vmem>>, %arg3: memref<8x1xf32, #tpu.memory_space<vmem>>, %arg4: memref<50x512xbf16, #tpu.memory_space<vmem>>, %arg5: memref<4x512xbf16, #tpu.memory_space<vmem>>, %arg6: memref<1x512xf32, #tpu.memory_space<vmem>>, %arg7: memref<512x256xbf16, #tpu.memory_space<vmem>>, %arg8: memref<1x256xf32, #tpu.memory_space<vmem>>, %arg9: memref<1x256xf32, #tpu.memory_space<vmem>>, %arg10: memref<1x1xf32, #tpu.memory_space<vmem>>, %arg11: memref<8x1xf32, #tpu.memory_space<vmem>>, %arg12: memref<8x256xbf16, #tpu.memory_space<vmem>>) attributes {dimension_semantics = [#tpu.dimension_semantics<parallel>], iteration_bounds = array<i64: 1>, scalar_prefetch = 0 : i64, scratch_operands = 0 : i64, tpu.core_type = #tpu.core_type<tc>, window_params = [{transform_indices = @transform_0, window_bounds = array<i64: 8, 50>}, {transform_indices = @transform_1, window_bounds = array<i64: 8, 1>}, {transform_indices = @transform_2, window_bounds = array<i64: 8, 1>}, {pipeline_mode = #tpu.pipeline_mode<synchronous>, transform_indices = @transform_3, window_bounds = array<i64: 50, 512>}, {pipeline_mode = #tpu.pipeline_mode<synchronous>, transform_indices = @transform_4, window_bounds = array<i64: 4, 512>}, {pipeline_mode = #tpu.pipeline_mode<synchronous>, transform_indices = @transform_5, window_bounds = array<i64: 1, 512>}, {pipeline_mode = #tpu.pipeline_mode<synchronous>, transform_indices = @transform_6, window_bounds = array<i64: 512, 256>}, {pipeline_mode = #tpu.pipeline_mode<synchronous>, transform_indices = @transform_7, window_bounds = array<i64: 1, 256>}, {pipeline_mode = #tpu.pipeline_mode<synchronous>, transform_indices = @transform_8, window_bounds = array<i64: 1, 256>}, {pipeline_mode = #tpu.pipeline_mode<synchronous>, transform_indices = @transform_9, window_bounds = array<i64: 1, 1>}, {transform_indices = @transform_10, window_bounds = array<i64: 8, 1>}, {transform_indices = @transform_11, window_bounds = array<i64: 8, 256>}]} {
    %c0 = arith.constant 0 : index
    %c0_0 = arith.constant 0 : index
    %0 = vector.load %arg1[%c0, %c0_0] : memref<8x50xf32, #tpu.memory_space<vmem>>, vector<8x50xf32>
    %1 = arith.truncf %0 : vector<8x50xf32> to vector<8x50xbf16>
    %c0_1 = arith.constant 0 : index
    %c0_2 = arith.constant 0 : index
    %2 = vector.load %arg4[%c0_1, %c0_2] : memref<50x512xbf16, #tpu.memory_space<vmem>>, vector<50x512xbf16>
    %cst = arith.constant dense<0.000000e+00> : vector<8x512xf32>
    %3 = tpu.matmul %1, %2, %cst {dimension_numbers = #tpu.dot_dimension_numbers<[1], [0], [0], [1], [0, 0, 1, 1], [], []>} : vector<8x50xbf16>, vector<50x512xbf16>, vector<8x512xf32> -> vector<8x512xf32>
    %c0_3 = arith.constant 0 : index
    %c0_4 = arith.constant 0 : index
    %4 = vector.load %arg2[%c0_3, %c0_4] : memref<8x1xi32, #tpu.memory_space<vmem>>, vector<8x1xi32>
    %5 = tpu.iota {dimensions = array<i32: 1>} : vector<8x4xi32>
    %6 = vector.broadcast %4 : vector<8x1xi32> to vector<8x4xi32>
    %7 = arith.cmpi eq, %5, %6 : vector<8x4xi32>
    %8 = arith.extui %7 : vector<8x4xi1> to vector<8x4xi32>
    %9 = arith.sitofp %8 : vector<8x4xi32> to vector<8x4xf32>
    %10 = arith.truncf %9 : vector<8x4xf32> to vector<8x4xbf16>
    %c3_i32 = arith.constant 3 : i32
    %11 = vector.broadcast %c3_i32 : i32 to vector<8x4xi32>
    %12 = arith.cmpi eq, %5, %11 : vector<8x4xi32>
    %c0_5 = arith.constant 0 : index
    %c0_6 = arith.constant 0 : index
    %13 = vector.load %arg3[%c0_5, %c0_6] : memref<8x1xf32, #tpu.memory_space<vmem>>, vector<8x1xf32>
    %14 = arith.truncf %13 : vector<8x1xf32> to vector<8x1xbf16>
    %15 = vector.shape_cast %14 : vector<8x1xbf16> to vector<8x1xbf16>
    %16 = vector.broadcast %15 : vector<8x1xbf16> to vector<8x4xbf16>
    %17 = arith.select %12, %16, %10 : vector<8x4xi1>, vector<8x4xbf16>
    %c0_7 = arith.constant 0 : index
    %c0_8 = arith.constant 0 : index
    %18 = vector.load %arg5[%c0_7, %c0_8] : memref<4x512xbf16, #tpu.memory_space<vmem>>, vector<4x512xbf16>
    %cst_9 = arith.constant dense<0.000000e+00> : vector<8x512xf32>
    %19 = tpu.matmul %17, %18, %cst_9 {dimension_numbers = #tpu.dot_dimension_numbers<[1], [0], [0], [1], [0, 0, 1, 1], [], []>} : vector<8x4xbf16>, vector<4x512xbf16>, vector<8x512xf32> -> vector<8x512xf32>
    %20 = arith.addf %3, %19 : vector<8x512xf32>
    %c0_10 = arith.constant 0 : index
    %c0_11 = arith.constant 0 : index
    %21 = vector.load %arg6[%c0_10, %c0_11] : memref<1x512xf32, #tpu.memory_space<vmem>>, vector<1x512xf32>
    %22 = vector.broadcast %21 : vector<1x512xf32> to vector<8x512xf32>
    %23 = arith.addf %20, %22 : vector<8x512xf32>
    %cst_12 = arith.constant 0.000000e+00 : f32
    %24 = vector.broadcast %cst_12 : f32 to vector<8x512xf32>
    %25 = arith.maximumf %23, %24 : vector<8x512xf32>
    %26 = arith.truncf %25 : vector<8x512xf32> to vector<8x512xbf16>
    %c0_13 = arith.constant 0 : index
    %c0_14 = arith.constant 0 : index
    %27 = vector.load %arg7[%c0_13, %c0_14] : memref<512x256xbf16, #tpu.memory_space<vmem>>, vector<512x256xbf16>
    %cst_15 = arith.constant dense<0.000000e+00> : vector<8x256xf32>
    %28 = tpu.matmul %26, %27, %cst_15 {dimension_numbers = #tpu.dot_dimension_numbers<[1], [0], [0], [1], [0, 0, 1, 1], [], []>} : vector<8x512xbf16>, vector<512x256xbf16>, vector<8x256xf32> -> vector<8x256xf32>
    %c0_16 = arith.constant 0 : index
    %c0_17 = arith.constant 0 : index
    %29 = vector.load %arg8[%c0_16, %c0_17] : memref<1x256xf32, #tpu.memory_space<vmem>>, vector<1x256xf32>
    %30 = vector.broadcast %29 : vector<1x256xf32> to vector<8x256xf32>
    %31 = arith.addf %28, %30 : vector<8x256xf32>
    %cst_18 = arith.constant 0.000000e+00 : f32
    %32 = vector.broadcast %cst_18 : f32 to vector<8x256xf32>
    %33 = arith.maximumf %31, %32 : vector<8x256xf32>
    %34 = arith.truncf %33 : vector<8x256xf32> to vector<8x256xbf16>
    %c0_19 = arith.constant 0 : index
    %c0_20 = arith.constant 0 : index
    %35 = vector.load %arg12[%c0_19, %c0_20] : memref<8x256xbf16, #tpu.memory_space<vmem>>, vector<8x256xbf16>
    tpu.vector_store %arg12[%c0_19, %c0_20], %34 {strides = array<i32>} : memref<8x256xbf16, #tpu.memory_space<vmem>>, vector<8x256xbf16>,
    %c0_21 = arith.constant 0 : index
    %c0_22 = arith.constant 0 : index
    %36 = vector.load %arg9[%c0_21, %c0_22] : memref<1x256xf32, #tpu.memory_space<vmem>>, vector<1x256xf32>
    %37 = vector.broadcast %36 : vector<1x256xf32> to vector<8x256xf32>
    %38 = arith.mulf %33, %37 : vector<8x256xf32>
    %cst_23 = arith.constant dense<0.000000e+00> : vector<8xf32>
    %39 = vector.multi_reduction <add>, %38, %cst_23 [1] : vector<8x256xf32> to vector<8xf32>
    %40 = vector.shape_cast %39 : vector<8xf32> to vector<8x1xf32>
    %c0_24 = arith.constant 0 : index
    %c0_25 = arith.constant 0 : index
    %41 = vector.load %arg10[%c0_24, %c0_25] : memref<1x1xf32, #tpu.memory_space<vmem>>, vector<1x1xf32>
    %42 = vector.broadcast %41 : vector<1x1xf32> to vector<8x1xf32>
    %43 = arith.addf %40, %42 : vector<8x1xf32>
    %c0_26 = arith.constant 0 : index
    %c0_27 = arith.constant 0 : index
    %44 = vector.load %arg11[%c0_26, %c0_27] : memref<8x1xf32, #tpu.memory_space<vmem>>, vector<8x1xf32>
    tpu.vector_store %arg11[%c0_26, %c0_27], %43 {strides = array<i32>} : memref<8x1xf32, #tpu.memory_space<vmem>>, vector<8x1xf32>,
    return
  }
  func.func @transform_0(%arg0: i32) -> (i32, i32) {
    %c0_i32 = arith.constant 0 : i32
    %c0_i32_0 = arith.constant 0 : i32
    return %arg0, %c0_i32 : i32, i32
  }
  func.func @transform_1(%arg0: i32) -> (i32, i32) {
    %c0_i32 = arith.constant 0 : i32
    %c0_i32_0 = arith.constant 0 : i32
    return %arg0, %c0_i32 : i32, i32
  }
  func.func @transform_2(%arg0: i32) -> (i32, i32) {
    %c0_i32 = arith.constant 0 : i32
    %c0_i32_0 = arith.constant 0 : i32
    return %arg0, %c0_i32 : i32, i32
  }
  func.func @transform_3(%arg0: i32) -> (i32, i32) {
    %c0_i32 = arith.constant 0 : i32
    %c0_i32_0 = arith.constant 0 : i32
    %c0_i32_1 = arith.constant 0 : i32
    return %c0_i32, %c0_i32_0 : i32, i32
  }
  func.func @transform_4(%arg0: i32) -> (i32, i32) {
    %c0_i32 = arith.constant 0 : i32
    %c0_i32_0 = arith.constant 0 : i32
    %c0_i32_1 = arith.constant 0 : i32
    return %c0_i32, %c0_i32_0 : i32, i32
  }
  func.func @transform_5(%arg0: i32) -> (i32, i32) {
    %c0_i32 = arith.constant 0 : i32
    %c0_i32_0 = arith.constant 0 : i32
    %c0_i32_1 = arith.constant 0 : i32
    return %c0_i32, %c0_i32_0 : i32, i32
  }
  func.func @transform_6(%arg0: i32) -> (i32, i32) {
    %c0_i32 = arith.constant 0 : i32
    %c0_i32_0 = arith.constant 0 : i32
    %c0_i32_1 = arith.constant 0 : i32
    return %c0_i32, %c0_i32_0 : i32, i32
  }
  func.func @transform_7(%arg0: i32) -> (i32, i32) {
    %c0_i32 = arith.constant 0 : i32
    %c0_i32_0 = arith.constant 0 : i32
    %c0_i32_1 = arith.constant 0 : i32
    return %c0_i32, %c0_i32_0 : i32, i32
  }
  func.func @transform_8(%arg0: i32) -> (i32, i32) {
    %c0_i32 = arith.constant 0 : i32
    %c0_i32_0 = arith.constant 0 : i32
    %c0_i32_1 = arith.constant 0 : i32
    return %c0_i32, %c0_i32_0 : i32, i32
  }
  func.func @transform_9(%arg0: i32) -> (i32, i32) {
    %c0_i32 = arith.constant 0 : i32
    %c0_i32_0 = arith.constant 0 : i32
    %c0_i32_1 = arith.constant 0 : i32
    return %c0_i32, %c0_i32_0 : i32, i32
  }
  func.func @transform_10(%arg0: i32) -> (i32, i32) {
    %c0_i32 = arith.constant 0 : i32
    %c0_i32_0 = arith.constant 0 : i32
    return %arg0, %c0_i32 : i32, i32
  }
  func.func @transform_11(%arg0: i32) -> (i32, i32) {
    %c0_i32 = arith.constant 0 : i32
    %c0_i32_0 = arith.constant 0 : i32
    return %arg0, %c0_i32 : i32, i32
  }
}

</mosaic_0001>

<bundles_post_ra>
// kernel: hybrid_rr_forward.1
= control target key start
LH: loop header
LB: loop body
LE: loop exit
PB: predicated region body
PF: predicated region fallthrough
CT: control target
= control target key end

     0   :  { %s1400_s0 = inlined_call_operand.vmem [shape: f32[8,50], index: 0, kind: input, shape index: {}]   ;;  %s1401_s1 = inlined_call_operand.vmem [shape: s32[8,1], index: 1, kind: input, shape index: {}]   ;;  %s1402_s2 = inlined_call_operand.vmem [shape: f32[8,1], index: 2, kind: input, shape index: {}]   ;;  %s1403_s3 = inlined_call_operand.hbm [shape: bf16[50,512], index: 3, kind: input, shape index: {}]   ;;  %s1404_s4 = inlined_call_operand.vmem [shape: bf16[4,512], index: 4, kind: input, shape index: {}]   ;;  %s1405_s5 = inlined_call_operand.vmem [shape: f32[1,512], index: 5, kind: input, shape index: {}]   ;;  %s1406_s6 = inlined_call_operand.hbm [shape: bf16[512,256], index: 6, kind: input, shape index: {}]   ;;  %s1407_s7 = inlined_call_operand.vmem [shape: f32[1,256], index: 7, kind: input, shape index: {}]   ;;  %s1408_s8 = inlined_call_operand.vmem [shape: f32[1,256], index: 8, kind: input, shape index: {}]   ;;  %s1409_s9 = inlined_call_operand.<no memory space> [shape: f32[1,1], index: 9, kind: input, shape index: {}]   ;;  %s1410_s10 = inlined_call_operand.vmem [shape: f32[8,1], index: 10, kind: output, shape index: {0}]   ;;  %s1411_s11 = inlined_call_operand.hbm [shape: bf16[8,256], index: 11, kind: output, shape index: {1}]  }
   0x1   :  { %v17_v0 = vstv %s1409_s9 }
   0x2   :  { %18 = vst [vmem:[#allocation2] sm:$0x1] %v17_v0 }
   0x3   :  { %19 = vsyncpa [#allocation4], 0 }
   0x4   :  { %20 = vsyncpa [#allocation7], 0 }
   0x5   :  { %21 = vsyncpa [#allocation5], 0  ;;  %s1260_s19 = smov [#allocation3]   ;;  %s1188_s23 = scalar_lea.hbm %s1403_s3, 1792 }
   0x6   :  { %s33_s20 = sshll.u32 %s1260_s19, 4  ;;  %p1189_p0 = scmp.ne.s32.totalorder %s1403_s3, %s1188_s23  ;;  %s34_s20 = int_to_ptr.vmem [resolvable:$true] %s33_s20 }
   0x7   :  { %p1192_p1 = scmp.lt.u32.totalorder %s1188_s23, %s1403_s3 }
   0x9   :  { %p1194_p2 = pnand %p1192_p1, %p1189_p0 }
   0xb   :  { %1197 = shalt.err (!%p1194_p2)
}
   0xc   :  { %s1198_s9 = scalar_lea.vmem %s34_s20, 1792  ;;  %p1203_p4 = scmp.lt.s32.totalorder %s34_s20, %s34_s20 }
   0xd   :  { %p1199_p3 = scmp.ne.s32.totalorder %s34_s20, %s1198_s9  ;;  %p1204_p5 = scmp.lt.s32.totalorder %s1198_s9, %s1198_s9 }
   0xf   :  { %p1205_p6 = por %p1204_p5, %p1203_p4 }
  0x11   :  { %p1206_p7 = pnand %p1205_p6, %p1199_p3 }
  0x13   :  { %1209 = shalt.err (!%p1206_p7)
}
  0x14   :  { %s1261_s28 = smov 256   ;;  %s1262_s29 = smov 16  }
  0x15   :  { %39 = dma.hbm_to_vmem [thread:$0]  %s1403_s3, 1792, %s34_s20, [#allocation4], %s1261_s28, %s1261_s28, %s1262_s29  }
  0x16   :  { %s1263_s13 = smov [#allocation6]   ;;  %s1210_s17 = scalar_lea.hbm %s1406_s6, 8192 }
  0x17   :  { %s49_s14 = sshll.u32 %s1263_s13, 4  ;;  %p1211_p8 = scmp.ne.s32.totalorder %s1406_s6, %s1210_s17  ;;  %s50_s14 = int_to_ptr.vmem [resolvable:$true] %s49_s14 }
  0x18   :  { %p1214_p9 = scmp.lt.u32.totalorder %s1210_s17, %s1406_s6 }
  0x1a   :  { %p1216_p10 = pnand %p1214_p9, %p1211_p8 }
  0x1c   :  { %1219 = shalt.err (!%p1216_p10)
}
  0x1d   :  { %s1220_s23 = scalar_lea.vmem %s50_s14, 8192  ;;  %p1225_p12 = scmp.lt.s32.totalorder %s50_s14, %s50_s14 }
  0x1e   :  { %p1221_p11 = scmp.ne.s32.totalorder %s50_s14, %s1220_s23  ;;  %p1226_p13 = scmp.lt.s32.totalorder %s1220_s23, %s1220_s23 }
  0x20   :  { %p1227_p0 = por %p1226_p13, %p1225_p12 }
  0x22   :  { %p1228_p1 = pnand %p1227_p0, %p1221_p11 }
  0x24   :  { %1231 = shalt.err (!%p1228_p1)
}
  0x25   :  { %s1264_s3 = smov 128   ;;  %s1265_s20 = smov 8  }
  0x26   :  { %55 = dma.hbm_to_vmem [thread:$0]  %s1406_s6, 8192, %s50_s14, [#allocation7], %s1264_s3, %s1264_s3, %s1265_s20  }
  0x27   :  { %1254 = dma.done.wait [#allocation4], 1792  }
  0x28   :  { %1255 = vsyncadd [#allocation4], 4294965504 }
  0x29   :  { %1256 = dma.done.wait [#allocation7], 8192  }
  0x2a   :  { %1257 = vsyncadd [#allocation7], 4294959104  ;;  %v86_v1 = vlaneseq  ;;  %v1266_v2 = vmov 0   ;;  %v1267_v3 = vmov 1983009808   ;;  %v85_v8 = vld [vmem:[%s1401_s1] sm:$0xff] }
  0x2b   :  { %1068 = vset.pattern.permute.xlu0 %v1266_v2  ;;  %v109_v4 = vunpack.c.l.s4 %v1267_v3  ;;  %173 = vmatprep.mubr.bf16.mxu0 %v1266_v2  ;;  %v96_v9 = vld [vmem:[%s1402_s2] sm:$0xff]  ;;  %vm128_vm0 = vcmask 1041408   ;;  %v1268_v23 = vmov 0.0   ;;  %v1073_v27 = vld [vmem:[#allocation3 + $0x8] ss:$16 sps:$4 sm:$0xff]   ;;  %vm124_vm4 = vcmask 31744  }
  0x2c   :  { %v1357_v5 = vshrl.u32 %v86_v1, 7  ;;  %214 = vmatprep.mubr.bf16.mxu1 %v1266_v2  ;;  %v105_v10 = vld [vmem:[%s1404_s4] sm:$0xff]  ;;  %89 = vperm.xlu0 %1068, %v85_v8   ;;  %v97_v11 = vpack.c.bf16 %v96_v9, %v96_v9  ;;  %v87_v21 = vand.u32 127, %v86_v1  ;;  %v1079_v33 = vld [vmem:[#allocation3 + $0x28] ss:$16 sps:$4 sm:$0xff]   ;;  %vm297_vm5 = vcmask 1040384  }
  0x2d   :  { %v110_v6 = vunpack.c.0.s8 %v109_v4  ;;  %v107_v13 = vcombine.high %v105_v10, %v105_v10  ;;  %v1072_v17 = vld [vmem:[#allocation3 + $0x4] ss:$16 sps:$4 sm:$0xff]   ;;  %v1075_v18 = vld [vmem:[#allocation3 + $0xc] ss:$16 sps:$4 sm:$0xff]   ;;  %v1070_v26 = vld [vmem:[#allocation3] ss:$16 sps:$4 sm:$0xff]  }
  0x2e   :  { %vm95_vm1 = vcmp.eq.s32.totalorder %v87_v21, 3  ;;  %v1078_v29 = vld [vmem:[#allocation3 + $0x24] ss:$16 sps:$4 sm:$0xff]   ;;  %v1081_v30 = vld [vmem:[#allocation3 + $0x2c] ss:$16 sps:$4 sm:$0xff]   ;;  %vm293_vm6 = vcmask 408576  }
  0x2f   :  { %v113_v7 = vsub.s32 %v110_v6, %v1357_v5  ;;  %vm103_vm3 = vmpackc.low %vm95_vm1, %vm95_vm1  ;;  %v1076_v32 = vld [vmem:[#allocation3 + $0x20] ss:$16 sps:$4 sm:$0xff]   ;;  %v1084_v34 = vld [vmem:[#allocation3 + $0x44] ss:$16 sps:$4 sm:$0xff]  }
  0x30   :  { %100 = vperm.xlu0 %1068, %v97_v11   ;;  %v1087_v35 = vld [vmem:[#allocation3 + $0x4c] ss:$16 sps:$4 sm:$0xff]   ;;  %v83_v36 = vld [vmem:[#allocation3 + $0x60] sm:$0x11]  ;;  %v1085_v39 = vld [vmem:[#allocation3 + $0x48] ss:$16 sps:$4 sm:$0xff]  }
  0x31   :  { %v114_v12 = vrot.slane %v105_v10, %v113_v7  ;;  %v121_v15 = vrot.slane %v107_v13, %v113_v7  ;;  %v84_v37 = vld [vmem:[#allocation3 + $0x68] sm:$0x11]  ;;  %v1082_v38 = vld [vmem:[#allocation3 + $0x40] ss:$16 sps:$4 sm:$0xff]   ;;  %v980_v40 = vcombine.high %v83_v36, %v83_v36  ;;  %v979_v42 = vcombine.low %v83_v36, %v83_v36  ;;  %v1094_v47 = vld [vmem:[#allocation6 + $0x4] ss:$8 sps:$4 sm:$0xff]  }
  0x32   :  { %v982_v41 = vcombine.high %v84_v37, %v84_v37  ;;  %v981_v43 = vcombine.low %v84_v37, %v84_v37  ;;  %v69_v44 = vld [vmem:[%s1400_s0] sm:$0xff]  ;;  %v1092_v50 = vld [vmem:[#allocation6] ss:$8 sps:$4 sm:$0xff]  }
  0x33   :  { %v122_v14 = vcombine.high %v114_v12, %v114_v12  ;;  %v130_v16 = vsel %vm128_vm0, %v114_v12, 0  ;;  %v123_v19 = vcombine.high %v121_v15, %v121_v15  ;;  %v136_v20 = vsel %vm128_vm0, %v121_v15, 0  ;;  %v1097_v48 = vld [vmem:[#allocation6 + $0x104] ss:$8 sps:$4 sm:$0xff]   ;;  %v1095_v51 = vld [vmem:[#allocation6 + $0x100] ss:$8 sps:$4 sm:$0xff]  }
  0x34   :  { %v299_v45 = vsel %vm297_vm5, %v979_v42, 0  ;;  %v305_v46 = vsel %vm297_vm5, %v981_v43, 0  ;;  %v70_v49 = vpack.c.bf16 %v69_v44, %v69_v44  ;;  %v1100_v52 = vld [vmem:[#allocation6 + $0x14] ss:$8 sps:$4 sm:$0xff]   ;;  %v1098_v54 = vld [vmem:[#allocation6 + $0x10] ss:$8 sps:$4 sm:$0xff]  }
  0x35   :  { %963 = vmatprep.subr.msk.bf16.mxu0 %vm128_vm0, %v122_v14  ;;  %965 = vmatprep.subr.msk.bf16.mxu1 %vm128_vm0, %v123_v19  ;;  %v1103_v53 = vld [vmem:[#allocation6 + $0x114] ss:$8 sps:$4 sm:$0xff]   ;;  %v1101_v55 = vld [vmem:[#allocation6 + $0x110] ss:$8 sps:$4 sm:$0xff]   ;;  %v1106_v56 = vld [vmem:[#allocation6 + $0x24] ss:$8 sps:$4 sm:$0xff]  }
  0x36   :  { %142 = vmatpush1.bf16.msra.mxu0 %v130_v16  ;;  %183 = vmatpush1.bf16.msra.mxu1 %v136_v20  ;;  %v1109_v57 = vld [vmem:[#allocation6 + $0x124] ss:$8 sps:$4 sm:$0xff]   ;;  %v1104_v58 = vld [vmem:[#allocation6 + $0x20] ss:$8 sps:$4 sm:$0xff]   ;;  %v1112_v60 = vld [vmem:[#allocation6 + $0x34] ss:$8 sps:$4 sm:$0xff]  }
  0x37   :  { %310 = vmatprep.subr.bf16.mxu0 %v1072_v17  ;;  %351 = vmatprep.subr.bf16.mxu1 %v1075_v18  ;;  %v1107_v59 = vld [vmem:[#allocation6 + $0x120] ss:$8 sps:$4 sm:$0xff]   ;;  %v1115_v61 = vld [vmem:[#allocation6 + $0x134] ss:$8 sps:$4 sm:$0xff]   ;;  %v1110_v62 = vld [vmem:[#allocation6 + $0x30] ss:$8 sps:$4 sm:$0xff]  }
  0x38   :  { %v1113_v63 = vld [vmem:[#allocation6 + $0x130] ss:$8 sps:$4 sm:$0xff]   ;;  %v1118_v0 = vld [vmem:[#allocation6 + $0x44] ss:$8 sps:$4 sm:$0xff]   ;;  %v1119_v3 = vld [vmem:[#allocation6 + $0x140] ss:$8 sps:$4 sm:$0xff]  }
  0x39   :  { %v1121_v1 = vld [vmem:[#allocation6 + $0x144] ss:$8 sps:$4 sm:$0xff]   ;;  %v1124_v4 = vld [vmem:[#allocation6 + $0x54] ss:$8 sps:$4 sm:$0xff]   ;;  %v1122_v7 = vld [vmem:[#allocation6 + $0x50] ss:$8 sps:$4 sm:$0xff]  }
  0x3a   :  { %v1127_v6 = vld [vmem:[#allocation6 + $0x154] ss:$8 sps:$4 sm:$0xff]   ;;  %v1125_v8 = vld [vmem:[#allocation6 + $0x150] ss:$8 sps:$4 sm:$0xff]   ;;  %v1130_v9 = vld [vmem:[#allocation6 + $0x64] ss:$8 sps:$4 sm:$0xff]  }
  0x3b   :  { %v1133_v10 = vld [vmem:[#allocation6 + $0x164] ss:$8 sps:$4 sm:$0xff]   ;;  %v1128_v11 = vld [vmem:[#allocation6 + $0x60] ss:$8 sps:$4 sm:$0xff]   ;;  %v1136_v13 = vld [vmem:[#allocation6 + $0x74] ss:$8 sps:$4 sm:$0xff]  }
  0x3c   :  { %v1131_v12 = vld [vmem:[#allocation6 + $0x160] ss:$8 sps:$4 sm:$0xff]   ;;  %v1139_v14 = vld [vmem:[#allocation6 + $0x174] ss:$8 sps:$4 sm:$0xff]   ;;  %v1134_v15 = vld [vmem:[#allocation6 + $0x70] ss:$8 sps:$4 sm:$0xff]  }
  0x3d   :  { %v1137_v16 = vld [vmem:[#allocation6 + $0x170] ss:$8 sps:$4 sm:$0xff]   ;;  %v1142_v17 = vld [vmem:[#allocation6 + $0x84] ss:$8 sps:$4 sm:$0xff]   ;;  %v1140_v19 = vld [vmem:[#allocation6 + $0x80] ss:$8 sps:$4 sm:$0xff]  }
  0x3e   :  { %v1145_v18 = vld [vmem:[#allocation6 + $0x184] ss:$8 sps:$4 sm:$0xff]   ;;  %v1143_v20 = vld [vmem:[#allocation6 + $0x180] ss:$8 sps:$4 sm:$0xff]   ;;  %v1172_v37 = vld [vmem:[#allocation6 + $0xd4] ss:$8 sps:$4 sm:$0xff]  }
  0x3f   :  { %v1167_v36 = vld [vmem:[#allocation6 + $0x1c0] ss:$8 sps:$4 sm:$0xff]   ;;  %v1181_v42 = vld [vmem:[#allocation6 + $0x1e4] ss:$8 sps:$4 sm:$0xff]  }
  0x40   :  { %v1176_v43 = vld [vmem:[#allocation6 + $0xe0] ss:$8 sps:$4 sm:$0xff]  }
  0x41   :  { %v1179_v44 = vld [vmem:[#allocation6 + $0x1e0] ss:$8 sps:$4 sm:$0xff]  }
  0xab   :  { %v90_v22 = vpop.permute.xlu0 %89 }
  0xac   :  { %vm91_vm2 = vcmp.eq.s32.totalorder %v87_v21, %v90_v22  ;;  %v1148_v21 = vld [vmem:[#allocation6 + $0x94] ss:$8 sps:$4 sm:$0xff]  }
  0xad   :  { %v962_v24 = vsel %vm91_vm2, 1.0, %v1268_v23  ;;  %v1151_v22 = vld [vmem:[#allocation6 + $0x194] ss:$8 sps:$4 sm:$0xff]   ;;  %v1146_v23 = vld [vmem:[#allocation6 + $0x90] ss:$8 sps:$4 sm:$0xff]  }
  0xae   :  { %v94_v25 = vpack.c.bf16 %v962_v24, %v962_v24  ;;  %v1149_v24 = vld [vmem:[#allocation6 + $0x190] ss:$8 sps:$4 sm:$0xff]  }
  0xaf   :  { %v101_v28 = vpop.permute.xlu0 %100 }
  0xb0   :  { %v104_v31 = vsel %vm103_vm3, %v101_v28, %v94_v25  ;;  %v1154_v25 = vld [vmem:[#allocation6 + $0xa4] ss:$8 sps:$4 sm:$0xff]   ;;  %v1155_v28 = vld [vmem:[#allocation6 + $0x1a0] ss:$8 sps:$4 sm:$0xff]  }
  0xb1   :  { %964 = vmatmul.mubr.msk.bf16.vlgmr.msra.gmra.mrb[0].mxu0 %vm124_vm4, %v104_v31  ;;  %966 = vmatmul.mubr.msk.bf16.vlgmr.msra.gmra.mrb[0].mxu1 %vm124_vm4, %v104_v31  ;;  %v1161_v31 = vld [vmem:[#allocation6 + $0x1b0] ss:$8 sps:$4 sm:$0xff]  }
  0xb2   :  { %311 = vmatpush1.bf16.msra.mxu0 %v1070_v26  ;;  %352 = vmatpush1.bf16.msra.mxu1 %v1073_v27  ;;  %v1157_v26 = vld [vmem:[#allocation6 + $0x1a4] ss:$8 sps:$4 sm:$0xff]   ;;  %v1152_v27 = vld [vmem:[#allocation6 + $0xa0] ss:$8 sps:$4 sm:$0xff]  }
  0xb3   :  { %312 = vmatprep.subr.bf16.mxu0 %v1078_v29  ;;  %353 = vmatprep.subr.bf16.mxu1 %v1081_v30  ;;  %v1160_v29 = vld [vmem:[#allocation6 + $0xb4] ss:$8 sps:$4 sm:$0xff]   ;;  %v1158_v30 = vld [vmem:[#allocation6 + $0xb0] ss:$8 sps:$4 sm:$0xff]  }
  0xb4   :  { %342 = vmatprep.mubr.bf16.mxu0 %v1266_v2  ;;  %383 = vmatprep.mubr.bf16.mxu1 %v1266_v2  ;;  %v1116_v2 = vld [vmem:[#allocation6 + $0x40] ss:$8 sps:$4 sm:$0xff]  }
  0xb6   :  { %313 = vmatpush1.bf16.msra.mxu0 %v1076_v32  ;;  %354 = vmatpush1.bf16.msra.mxu1 %v1079_v33  ;;  %v1163_v32 = vld [vmem:[#allocation6 + $0x1b4] ss:$8 sps:$4 sm:$0xff]   ;;  %v1166_v33 = vld [vmem:[#allocation6 + $0xc4] ss:$8 sps:$4 sm:$0xff]  }
  0xb7   :  { %314 = vmatprep.subr.bf16.mxu0 %v1084_v34  ;;  %355 = vmatprep.subr.bf16.mxu1 %v1087_v35  ;;  %v1169_v34 = vld [vmem:[#allocation6 + $0x1c4] ss:$8 sps:$4 sm:$0xff]   ;;  %v1164_v35 = vld [vmem:[#allocation6 + $0xc0] ss:$8 sps:$4 sm:$0xff]  }
  0xba   :  { %315 = vmatpush1.bf16.msra.mxu0 %v1082_v38  ;;  %356 = vmatpush1.bf16.msra.mxu1 %v1085_v39  ;;  %v1175_v38 = vld [vmem:[#allocation6 + $0x1d4] ss:$8 sps:$4 sm:$0xff]   ;;  %v1170_v39 = vld [vmem:[#allocation6 + $0xd0] ss:$8 sps:$4 sm:$0xff]  }
  0xbb   :  { %983 = vmatprep.subr.msk.bf16.mxu0 %vm297_vm5, %v980_v40  ;;  %985 = vmatprep.subr.msk.bf16.mxu1 %vm297_vm5, %v982_v41  ;;  %v1173_v40 = vld [vmem:[#allocation6 + $0x1d0] ss:$8 sps:$4 sm:$0xff]   ;;  %v1178_v41 = vld [vmem:[#allocation6 + $0xe4] ss:$8 sps:$4 sm:$0xff]  }
  0xbe   :  { %317 = vmatpush1.bf16.msra.mxu0 %v299_v45  ;;  %358 = vmatpush1.bf16.msra.mxu1 %v305_v46  ;;  %v1184_v45 = vld [vmem:[#allocation6 + $0xf4] ss:$8 sps:$4 sm:$0xff]  }
  0xbf   :  { %822 = vmatprep.subr.bf16.mxu1 %v1094_v47  ;;  %863 = vmatprep.subr.bf16.mxu0 %v1097_v48  ;;  %v1187_v46 = vld [vmem:[#allocation6 + $0x1f4] ss:$8 sps:$4 sm:$0xff]   ;;  %v1182_v47 = vld [vmem:[#allocation6 + $0xf0] ss:$8 sps:$4 sm:$0xff]  }
  0xc0   :  { %v1185_v48 = vld [vmem:[#allocation6 + $0x1f0] ss:$8 sps:$4 sm:$0xff]  }
  0xc1   :  { %984 = vmatmul.mubr.msk.bf16.vlgmr.msra.gmra.mrb[4].mxu0 %vm293_vm6, %v70_v49  ;;  %986 = vmatmul.mubr.msk.bf16.vlgmr.msra.gmra.mrb[4].mxu1 %vm293_vm6, %v70_v49 }
  0xc2   :  { %823 = vmatpush1.bf16.msra.mxu1 %v1092_v50  ;;  %864 = vmatpush1.bf16.msra.mxu0 %v1095_v51 }
  0xc3   :  { %824 = vmatprep.subr.bf16.mxu1 %v1100_v52  ;;  %865 = vmatprep.subr.bf16.mxu0 %v1103_v53 }
  0xc6   :  { %825 = vmatpush1.bf16.msra.mxu1 %v1098_v54  ;;  %866 = vmatpush1.bf16.msra.mxu0 %v1101_v55 }
  0xc7   :  { %826 = vmatprep.subr.bf16.mxu1 %v1106_v56  ;;  %867 = vmatprep.subr.bf16.mxu0 %v1109_v57  ;;  %v396_v57 = vsub.s32 0, %v1357_v5 }
  0xca   :  { %827 = vmatpush1.bf16.msra.mxu1 %v1104_v58  ;;  %868 = vmatpush1.bf16.msra.mxu0 %v1107_v59  ;;  %v404_v58 = vsub.s32 2, %v1357_v5  ;;  %v392_v59 = vld [vmem:[%s1405_s5] sm:$0xf] }
  0xcb   :  { %828 = vmatprep.subr.bf16.mxu1 %v1112_v60  ;;  %869 = vmatprep.subr.bf16.mxu0 %v1115_v61  ;;  %v400_v60 = vsub.s32 1, %v1357_v5  ;;  %v408_v61 = vsub.s32 3, %v1357_v5 }
  0xce   :  { %829 = vmatpush1.bf16.msra.mxu1 %v1110_v62  ;;  %870 = vmatpush1.bf16.msra.mxu0 %v1113_v63  ;;  %v397_v62 = vrot.slane %v392_v59, %v396_v57  ;;  %v405_v63 = vrot.slane %v392_v59, %v404_v58 }
  0xcf   :  { %830 = vmatprep.subr.bf16.mxu1 %v1118_v0  ;;  %871 = vmatprep.subr.bf16.mxu0 %v1121_v1 }
  0xd2   :  { %831 = vmatpush1.bf16.msra.mxu1 %v1116_v2  ;;  %872 = vmatpush1.bf16.msra.mxu0 %v1119_v3  ;;  %v401_v2 = vrot.slane %v392_v59, %v400_v60  ;;  %v409_v3 = vrot.slane %v392_v59, %v408_v61 }
  0xd3   :  { %832 = vmatprep.subr.bf16.mxu1 %v1124_v4  ;;  %873 = vmatprep.subr.bf16.mxu0 %v1127_v6 }
  0xd6   :  { %833 = vmatpush1.bf16.msra.mxu1 %v1122_v7  ;;  %874 = vmatpush1.bf16.msra.mxu0 %v1125_v8 }
  0xd7   :  { %834 = vmatprep.subr.bf16.mxu1 %v1130_v9  ;;  %875 = vmatprep.subr.bf16.mxu0 %v1133_v10 }
  0xda   :  { %835 = vmatpush1.bf16.msra.mxu1 %v1128_v11  ;;  %876 = vmatpush1.bf16.msra.mxu0 %v1131_v12 }
  0xdb   :  { %836 = vmatprep.subr.bf16.mxu1 %v1136_v13  ;;  %877 = vmatprep.subr.bf16.mxu0 %v1139_v14 }
  0xde   :  { %837 = vmatpush1.bf16.msra.mxu1 %v1134_v15  ;;  %878 = vmatpush1.bf16.msra.mxu0 %v1137_v16 }
  0xdf   :  { %838 = vmatprep.subr.bf16.mxu1 %v1142_v17  ;;  %879 = vmatprep.subr.bf16.mxu0 %v1145_v18 }
  0xe2   :  { %839 = vmatpush1.bf16.msra.mxu1 %v1140_v19  ;;  %880 = vmatpush1.bf16.msra.mxu0 %v1143_v20 }
  0xe3   :  { %840 = vmatprep.subr.bf16.mxu1 %v1148_v21  ;;  %881 = vmatprep.subr.bf16.mxu0 %v1151_v22 }
  0xe6   :  { %841 = vmatpush1.bf16.msra.mxu1 %v1146_v23  ;;  %882 = vmatpush1.bf16.msra.mxu0 %v1149_v24 }
  0xe7   :  { %842 = vmatprep.subr.bf16.mxu1 %v1154_v25  ;;  %883 = vmatprep.subr.bf16.mxu0 %v1157_v26  ;;  %v490_v26 = vld [vmem:[%s1407_s7] sm:$0x3]  ;;  %s1269_s7 = smov [#allocation8]  }
  0xea   :  { %843 = vmatpush1.bf16.msra.mxu1 %v1152_v27  ;;  %884 = vmatpush1.bf16.msra.mxu0 %v1155_v28  ;;  %v495_v27 = vrot.slane %v490_v26, %v396_v57  ;;  %v499_v28 = vrot.slane %v490_v26, %v400_v60 }
  0xeb   :  { %844 = vmatprep.subr.bf16.mxu1 %v1160_v29  ;;  %885 = vmatprep.subr.bf16.mxu0 %v1163_v32 }
  0xee   :  { %845 = vmatpush1.bf16.msra.mxu1 %v1158_v30  ;;  %886 = vmatpush1.bf16.msra.mxu0 %v1161_v31  ;;  %v915_v31 = vld [vmem:[%s1408_s8] sm:$0x3]  ;;  %s950_s8 = sshll.u32 %s1269_s7, 4  ;;  %s951_s8 = int_to_ptr.vmem [resolvable:$true] %s950_s8 }
  0xef   :  { %846 = vmatprep.subr.bf16.mxu1 %v1166_v33  ;;  %887 = vmatprep.subr.bf16.mxu0 %v1169_v34  ;;  %s1232_s14 = scalar_lea.vmem %s951_s8, 128  ;;  %p1237_p3 = scmp.lt.s32.totalorder %s951_s8, %s951_s8 }
  0xf0   :  { %p1233_p2 = scmp.ne.s32.totalorder %s951_s8, %s1232_s14  ;;  %p1238_p4 = scmp.lt.s32.totalorder %s1232_s14, %s1232_s14 }
  0xf2   :  { %847 = vmatpush1.bf16.msra.mxu1 %v1164_v35  ;;  %888 = vmatpush1.bf16.msra.mxu0 %v1167_v36  ;;  %p1239_p5 = por %p1238_p4, %p1237_p3 }
  0xf3   :  { %848 = vmatprep.subr.bf16.mxu1 %v1172_v37  ;;  %889 = vmatprep.subr.bf16.mxu0 %v1175_v38 }
  0xf4   :  { %p1240_p6 = pnand %p1239_p5, %p1233_p2 }
  0xf6   :  { %849 = vmatpush1.bf16.msra.mxu1 %v1170_v39  ;;  %890 = vmatpush1.bf16.msra.mxu0 %v1173_v40 }
  0xf7   :  { %850 = vmatprep.subr.bf16.mxu1 %v1178_v41  ;;  %891 = vmatprep.subr.bf16.mxu0 %v1181_v42  ;;  %v920_v41 = vrot.slane %v915_v31, %v396_v57 }
  0xfa   :  { %851 = vmatpush1.bf16.msra.mxu1 %v1176_v43  ;;  %892 = vmatpush1.bf16.msra.mxu0 %v1179_v44  ;;  %v924_v43 = vrot.slane %v915_v31, %v400_v60 }
  0xfb   :  { %852 = vmatprep.subr.bf16.mxu1 %v1184_v45  ;;  %893 = vmatprep.subr.bf16.mxu0 %v1187_v46 }
  0xfe   :  { %853 = vmatpush1.bf16.msra.mxu1 %v1182_v47  ;;  %894 = vmatpush1.bf16.msra.mxu0 %v1185_v48 }
 0x184   :  { %v175_v49 = vpop.f32.mrb[0].mxu0  ;;  %v216_v50 = vpop.f32.mrb[0].mxu1 }
 0x185   :  { %v177_v51 = vpop.f32.mrb[1].mxu0  ;;  %v218_v52 = vpop.f32.mrb[1].mxu1 }
 0x186   :  { %v179_v53 = vpop.f32.mrb[2].mxu0  ;;  %v220_v54 = vpop.f32.mrb[2].mxu1 }
 0x187   :  { %v180_v55 = vpop.f32.mrb[3].mxu0  ;;  %v221_v56 = vpop.f32.mrb[3].mxu1 }
 0x194   :  { %v344_v0 = vpop.f32.mrb[4].mxu0  ;;  %v385_v1 = vpop.f32.mrb[4].mxu1 }
 0x195   :  { %v345_v4 = vadd.f32 %v344_v0, %v175_v49  ;;  %v386_v6 = vadd.f32 %v385_v1, %v216_v50  ;;  %v346_v7 = vpop.f32.mrb[5].mxu0  ;;  %v387_v8 = vpop.f32.mrb[5].mxu1 }
 0x196   :  { %v347_v9 = vadd.f32 %v346_v7, %v177_v51  ;;  %v388_v10 = vadd.f32 %v387_v8, %v218_v52  ;;  %v348_v11 = vpop.f32.mrb[6].mxu0  ;;  %v389_v12 = vpop.f32.mrb[6].mxu1 }
 0x197   :  { %v414_v13 = vadd.f32 %v397_v62, %v345_v4  ;;  %v416_v14 = vadd.f32 %v405_v63, %v386_v6  ;;  %v349_v15 = vpop.f32.mrb[7].mxu0  ;;  %v390_v16 = vpop.f32.mrb[7].mxu1 }
 0x198   :  { %v415_v17 = vadd.f32 %v401_v2, %v347_v9  ;;  %v417_v5 = vadd.f32 %v409_v3, %v388_v10 }
 0x199   :  { %v418_v18 = vmax.f32 %v414_v13, 0.0  ;;  %v420_v19 = vmax.f32 %v416_v14, 0.0 }
 0x19a   :  { %v419_v20 = vmax.f32 %v415_v17, 0.0  ;;  %v421_v21 = vmax.f32 %v417_v5, 0.0 }
 0x19b   :  { %v422_v24 = vpack.c.bf16 %v418_v18, %v418_v18  ;;  %v424_v25 = vpack.c.bf16 %v420_v19, %v420_v19 }
 0x19c   :  { %v423_v22 = vpack.c.bf16 %v419_v20, %v419_v20  ;;  %v425_v23 = vpack.c.bf16 %v421_v21, %v421_v21 }
 0x19e   :  { %854 = vmatprep.mubr.bf16.mxu1 %v423_v22  ;;  %895 = vmatprep.mubr.bf16.mxu0 %v425_v23 }
 0x19f   :  { %855 = vmatmul.mubr.bf16.vlgmr.msra.gmra.mrb[8].mxu1 %v422_v24  ;;  %896 = vmatmul.mubr.bf16.vlgmr.msra.gmra.mrb[8].mxu0 %v424_v25 }
 0x272   :  { %v856_v29 = vpop.f32.mrb[8].mxu1  ;;  %v897_v30 = vpop.f32.mrb[8].mxu0 }
 0x273   :  { %v857_v32 = vadd.f32 %v856_v29, %v495_v27  ;;  %v858_v33 = vpop.f32.mrb[9].mxu1  ;;  %v899_v34 = vpop.f32.mrb[9].mxu0 }
 0x274   :  { %v859_v35 = vadd.f32 %v858_v33, %v499_v28  ;;  %v860_v36 = vpop.f32.mrb[10].mxu1  ;;  %v901_v37 = vpop.f32.mrb[10].mxu0 }
 0x275   :  { %v898_v38 = vadd.f32 %v897_v30, %v857_v32  ;;  %v861_v39 = vpop.f32.mrb[11].mxu1  ;;  %v902_v40 = vpop.f32.mrb[11].mxu0 }
 0x276   :  { %v900_v42 = vadd.f32 %v899_v34, %v859_v35 }
 0x277   :  { %v904_v44 = vmax.f32 %v898_v38, 0.0 }
 0x278   :  { %v905_v45 = vmax.f32 %v900_v42, 0.0 }
 0x279   :  { %v927_v46 = vmul.f32 %v920_v41, %v904_v44 }
 0x27a   :  { %v1053_v47 = vpack.c.bf16 %v905_v45, %v904_v44  ;;  %v928_v48 = vmul.f32 %v924_v43, %v905_v45 }
 0x27c   :  { %914 = vst [vmem:[#allocation8] sm:$0xff] %v1053_v47  ;;  %v929_v49 = vadd.f32 %v928_v48, %v927_v46 }
 0x27e   :  { %930 = vadd.xlane.f32.xlu1 %v929_v49 }
 0x27f   :  { %1243 = shalt.err (!%p1240_p6)
}
 0x280   :  { %s1244_s17 = scalar_lea.hbm %s1411_s11, 128 }
 0x281   :  { %p1245_p7 = scmp.ne.s32.totalorder %s1411_s11, %s1244_s17  ;;  %p1248_p8 = scmp.lt.u32.totalorder %s1244_s17, %s1411_s11 }
 0x283   :  { %p1250_p9 = pnand %p1248_p8, %p1245_p7 }
 0x285   :  { %1253 = shalt.err (!%p1250_p9)
}
 0x286   :  { %953 = dma.vmem_to_hbm [thread:$0]  %s951_s8, 128, %s1411_s11, [#allocation5]   ;;  %v1052_v50 = vld [vmem:[#allocation2] ss:$0 sm:$0xff]  ;;  %vm940_vm7 = vcmask 7168  }
 0x30b   :  { %v931_v51 = vpop.xlane.xlu1 %930 }
 0x30c   :  { %v939_v52 = vadd.f32 %v1052_v50, %v931_v51 }
 0x30e   :  { %941 = vst.msk [vmem:[%s1410_s10] sm:$0xff] %vm940_vm7, %v939_v52 }
 0x30f   :  { %1258 = dma.done.wait [#allocation5], 128  }
 0x310   :  { %1259 = vsyncadd [#allocation5], 4294967168 }
 0x311   :  { %959 = vsyncpa [#allocation4], 1 }
 0x312   :  { %960 = vsyncpa [#allocation7], 1 }
 0x313   :  { %961 = vsyncpa [#allocation5], 1 }

</bundles_post_ra>
